<compile_context>
chip_gen: v7x
topology: tpu7x:2x2x1
jax: 0.10.0
libtpu: 0.0.40
codegen_flags: <defaults>
</compile_context>

<pallas_src>
import math
from functools import lru_cache, partial

import jax
import jax.numpy as jnp
from jax.experimental import pallas as pl
from jax.experimental.pallas import tpu as pltpu


def _round_up(n: int, m: int) -> int:
    return ((n + m - 1) // m) * m


# ----------------------------------------------------------------------------
# Hardware-aware defaults (queried once)
# ----------------------------------------------------------------------------
@lru_cache(maxsize=1)
def _tpu_defaults():
    """Returns (vmem_capacity_bytes, default_tile_b)."""
    vmem_cap = 64 * 1024 * 1024  # conservative fallback (v7x per-TC)
    try:
        vmem_cap = int(pltpu.get_tpu_info().vmem_capacity_bytes)
    except Exception:
        pass
    kind = ""
    try:
        kind = jax.devices()[0].device_kind.lower()
    except Exception:
        pass
    # v5e MXU is 4x128^2 -> 128-row tiles; v6e/v7x MXU is 2x256^2 -> 256 rows.
    tile_b = 128 if "v5" in kind else 256
    return vmem_cap, tile_b


# ----------------------------------------------------------------------------
# Pallas kernel
# ----------------------------------------------------------------------------
def _make_packnet_kernel(n_layers: int):
    """Kernel over refs: (x, w1, b1, ..., wN, bN, task_mask_row, out).

    x, w*        : bf16   (batch tile / padded weight matrices)
    b*, mask     : f32    (1, d_out_pad) rows, broadcast over the batch tile
    out          : bf16   (tile_b, d_out_pad)
    """

    def kernel(x_ref, *refs):
        out_ref = refs[-1]
        mask_ref = refs[-2]

        h = x_ref[...]                                   # bf16 (tile_b, d0)
        acc = None
        for i in range(n_layers):
            w = refs[2 * i][...]                         # bf16 (d_i, d_{i+1})
            b = refs[2 * i + 1][...]                     # f32  (1,   d_{i+1})
            acc = jnp.dot(h, w, preferred_element_type=jnp.float32) + b
            if i < n_layers - 1:
                # ReLU in f32 on the accumulator, narrow for the next MXU pass.
                h = jnp.maximum(acc, 0.0).astype(jnp.bfloat16)

        # final: task_mask[task_id] * last_linear(x)   (f32 epilogue, bf16 store)
        out_ref[...] = (mask_ref[...] * acc).astype(out_ref.dtype)

    return kernel


# ----------------------------------------------------------------------------
# One-time parameter preparation (pad + cast OUTSIDE the per-call forward)
# ----------------------------------------------------------------------------
def prepare_packnet_params(params, task_mask):
    """Pad every weight/bias/mask to lane-dense (multiple-of-128) widths and
    cast weights to bf16 once; reuse the result across forward calls."""
    n_layers = len(params)
    widths = [params[0][0].shape[0]] + [w.shape[1] for (w, _) in params]
    widths_pad = [_round_up(w, 128) for w in widths]

    flat = []
    for i, (w, b) in enumerate(params):
        wp = jnp.zeros((widths_pad[i], widths_pad[i + 1]), jnp.bfloat16)
        wp = wp.at[: widths[i], : widths[i + 1]].set(w.astype(jnp.bfloat16))
        bp = jnp.zeros((1, widths_pad[i + 1]), jnp.float32)
        bp = bp.at[:, : widths[i + 1]].set(b.reshape(1, -1).astype(jnp.float32))
        flat += [wp, bp]

    num_tasks = task_mask.shape[0]
    mp = jnp.zeros((num_tasks, widths_pad[-1]), jnp.float32)
    mp = mp.at[:, : widths[-1]].set(task_mask.astype(jnp.float32))

    return {
        "flat": tuple(flat),                 # (w1, b1, ..., wN, bN) padded
        "mask": mp,                          # (num_tasks, d_out_pad) f32
        "widths": tuple(int(v) for v in widths),
        "widths_pad": tuple(int(v) for v in widths_pad),
        "n_layers": n_layers,
    }


# ----------------------------------------------------------------------------
# Forward
# ----------------------------------------------------------------------------
@partial(jax.jit,
         static_argnames=("widths", "widths_pad", "task_id", "tile_b",
                          "vmem_cap"))
def _packnet_forward_impl(x, flat_params, mask_pad, *, widths, widths_pad,
                          task_id: int, tile_b: int, vmem_cap: int):
    n_layers = len(widths) - 1
    B = x.shape[0]
    x2d = x.reshape(B, -1)
    d_in = x2d.shape[1]
    assert d_in == widths[0], "input feature size mismatch"
    d_out, d_out_pad = widths[-1], widths_pad[-1]

    # ---- batch tiling: don't pad tiny batches up to tile_b ------------------
    if B <= tile_b:
        tb = max(_round_up(B, 16), 16)       # sublane-aligned single tile
        B_pad = tb
    else:
        tb = tile_b
        B_pad = _round_up(B, tb)
    grid = (B_pad // tb,)

    # ---- pad + cast the activations (per-call data only) --------------------
    xp = jnp.zeros((B_pad, widths_pad[0]), jnp.bfloat16)
    xp = xp.at[:B, :d_in].set(x2d.astype(jnp.bfloat16))

    mask_row = mask_pad[task_id:task_id + 1]             # (1, d_out_pad) f32

    # ---- specs: stream batch tiles; params stay VMEM-resident (1 buffer) ----
    resident = pl.Buffered(1)
    in_specs = [pl.BlockSpec((tb, widths_pad[0]), lambda i: (i, 0))]
    for li in range(n_layers):
        in_specs.append(
            pl.BlockSpec((widths_pad[li], widths_pad[li + 1]),
                         lambda i: (0, 0), pipeline_mode=resident))
        in_specs.append(
            pl.BlockSpec((1, widths_pad[li + 1]),
                         lambda i: (0, 0), pipeline_mode=resident))
    in_specs.append(
        pl.BlockSpec((1, d_out_pad), lambda i: (0, 0), pipeline_mode=resident))

    out_specs = pl.BlockSpec((tb, d_out_pad), lambda i: (i, 0))
    out_shape = jax.ShapeDtypeStruct((B_pad, d_out_pad), jnp.bfloat16)

    # ---- cost estimate + generation-aware VMEM budget -----------------------
    weight_bytes = sum(
        widths_pad[i] * widths_pad[i + 1] * 2 + widths_pad[i + 1] * 4
        for i in range(n_layers)) + d_out_pad * 4        # single-buffered
    x_tile_bytes = tb * widths_pad[0] * 2
    out_tile_bytes = tb * d_out_pad * 2
    act_bytes = 3 * tb * max(widths_pad) * 4             # live f32 acc + bf16 h
    needed = weight_bytes + 2 * x_tile_bytes + 2 * out_tile_bytes + act_bytes

    cap = int(vmem_cap * 0.75)                           # ~48 MiB v7x, ~96 MiB v5e/v6e
    vmem_limit = int(min(max(int(needed * 1.5), 8 * 1024 * 1024), cap))

    flops = 2 * B_pad * sum(
        widths_pad[i] * widths_pad[i + 1] for i in range(n_layers))
    bytes_accessed = xp.size * 2 + weight_bytes + B_pad * d_out_pad * 2
    cost = pl.CostEstimate(
        flops=flops, transcendentals=0, bytes_accessed=bytes_accessed)

    out = pl.pallas_call(
        _make_packnet_kernel(n_layers),
        out_shape=out_shape,
        grid=grid,
        in_specs=in_specs,
        out_specs=out_specs,
        compiler_params=pltpu.CompilerParams(
            dimension_semantics=("parallel",),
            vmem_limit_bytes=vmem_limit),
        cost_estimate=cost,
    )(xp, *flat_params, mask_row)

    return out[:B, :d_out]


def packnet_forward(x, prepared, task_id: int, tile_b: int | None = None):
    """PackNet.forward(x, task_id) using pre-padded params from
    prepare_packnet_params."""
    vmem_cap, default_tb = _tpu_defaults()
    if tile_b is None:
        tile_b = default_tb
    return _packnet_forward_impl(
        x, prepared["flat"], prepared["mask"],
        widths=prepared["widths"], widths_pad=prepared["widths_pad"],
        task_id=int(task_id), tile_b=int(tile_b), vmem_cap=int(vmem_cap))


# ----------------------------------------------------------------------------
# Deterministic parameter init (mirrors WiseLinear.reset_parameters)
# ----------------------------------------------------------------------------
def init_packnet_params(key, widths):
    """kaiming_uniform_(a=sqrt(5)) => U(-1/sqrt(fan_in), 1/sqrt(fan_in)) for
    both weight and bias (fan_in = in_features)."""
    params = []
    for i in range(len(widths) - 1):
        d_in, d_out = widths[i], widths[i + 1]
        key, kw, kb = jax.random.split(key, 3)
        bound = 1.0 / math.sqrt(d_in)
        w = jax.random.uniform(kw, (d_in, d_out), jnp.float32, -bound, bound)
        b = jax.random.uniform(kb, (d_out,), jnp.float32, -bound, bound)
        # PrunableParameter visibility mask (allocation == 0 -> visible for any
        # task_id >= 0), applied here as identity on a fresh network.
        allocation = jnp.zeros_like(w, dtype=jnp.int32)
        w = w * (allocation <= 0).astype(jnp.float32)
        params.append((w, b))
    return params


def packnet_reference(x, params, task_mask, task_id):
    """Pure-JAX reference in matching precision (bf16 operands, f32 accum)."""
    h = x.reshape(x.shape[0], -1).astype(jnp.bfloat16)
    acc = None
    for i, (w, b) in enumerate(params):
        acc = jnp.dot(h, w.astype(jnp.bfloat16),
                      preferred_element_type=jnp.float32) + b.astype(jnp.float32)
        if i < len(params) - 1:
            h = jnp.maximum(acc, 0.0).astype(jnp.bfloat16)
    return task_mask[task_id].astype(jnp.float32) * acc


# ----------------------------------------------------------------------------
# Main
# ----------------------------------------------------------------------------
if __name__ == "__main__":
    key = jax.random.PRNGKey(0)

    # Small, forward-consistent shapes: x (B=2, C=4, H=4, W=4) -> flatten -> 64
    widths = (64, 128, 128, 32)
    num_tasks = 3
    task_id = 1

    key, kx, km = jax.random.split(key, 3)
    x = jax.random.normal(kx, (2, 4, 4, 4), jnp.float32)

    # task_mask: one binary row per task over the output units
    task_mask = (jax.random.uniform(km, (num_tasks, widths[-1])) > 0.5).astype(
        jnp.float32
    )

    params = init_packnet_params(key, widths)
    prepared = prepare_packnet_params(params, task_mask)   # pad/cast once

    out = packnet_forward(x, prepared, task_id)
    out = jax.block_until_ready(out)

    ref = packnet_reference(x, params, task_mask, task_id)
    assert out.shape == (2, widths[-1])
    assert jnp.allclose(out.astype(jnp.float32), ref, atol=3e-2, rtol=3e-2), \
        "mismatch vs reference"

    print("KERNEL_OK")
</pallas_src>

<mosaic_0001>
module attributes {stable_mosaic.version = 11 : i64} {
  func.func @kernel(%arg0: i32, %arg1: memref<16x128xbf16, #tpu.memory_space<vmem>>, %arg2: memref<128x128xbf16, #tpu.memory_space<vmem>>, %arg3: memref<1x128xf32, #tpu.memory_space<vmem>>, %arg4: memref<128x128xbf16, #tpu.memory_space<vmem>>, %arg5: memref<1x128xf32, #tpu.memory_space<vmem>>, %arg6: memref<128x128xbf16, #tpu.memory_space<vmem>>, %arg7: memref<1x128xf32, #tpu.memory_space<vmem>>, %arg8: memref<1x128xf32, #tpu.memory_space<vmem>>, %arg9: memref<16x128xbf16, #tpu.memory_space<vmem>>) attributes {dimension_semantics = [#tpu.dimension_semantics<parallel>], iteration_bounds = array<i64: 1>, scalar_prefetch = 0 : i64, scratch_operands = 0 : i64, tpu.core_type = #tpu.core_type<tc>, window_params = [{transform_indices = @transform_0, window_bounds = array<i64: 16, 128>}, {pipeline_mode = #tpu.pipeline_mode<synchronous>, transform_indices = @transform_1, window_bounds = array<i64: 128, 128>}, {pipeline_mode = #tpu.pipeline_mode<synchronous>, transform_indices = @transform_2, window_bounds = array<i64: 1, 128>}, {pipeline_mode = #tpu.pipeline_mode<synchronous>, transform_indices = @transform_3, window_bounds = array<i64: 128, 128>}, {pipeline_mode = #tpu.pipeline_mode<synchronous>, transform_indices = @transform_4, window_bounds = array<i64: 1, 128>}, {pipeline_mode = #tpu.pipeline_mode<synchronous>, transform_indices = @transform_5, window_bounds = array<i64: 128, 128>}, {pipeline_mode = #tpu.pipeline_mode<synchronous>, transform_indices = @transform_6, window_bounds = array<i64: 1, 128>}, {pipeline_mode = #tpu.pipeline_mode<synchronous>, transform_indices = @transform_7, window_bounds = array<i64: 1, 128>}, {transform_indices = @transform_8, window_bounds = array<i64: 16, 128>}]} {
    %c0 = arith.constant 0 : index
    %c0_0 = arith.constant 0 : index
    %0 = vector.load %arg1[%c0, %c0_0] : memref<16x128xbf16, #tpu.memory_space<vmem>>, vector<16x128xbf16>
    %c0_1 = arith.constant 0 : index
    %c0_2 = arith.constant 0 : index
    %1 = vector.load %arg2[%c0_1, %c0_2] : memref<128x128xbf16, #tpu.memory_space<vmem>>, vector<128x128xbf16>
    %c0_3 = arith.constant 0 : index
    %c0_4 = arith.constant 0 : index
    %2 = vector.load %arg3[%c0_3, %c0_4] : memref<1x128xf32, #tpu.memory_space<vmem>>, vector<1x128xf32>
    %cst = arith.constant dense<0.000000e+00> : vector<16x128xf32>
    %3 = tpu.matmul %0, %1, %cst {dimension_numbers = #tpu.dot_dimension_numbers<[1], [0], [0], [1], [0, 0, 1, 1], [], []>} : vector<16x128xbf16>, vector<128x128xbf16>, vector<16x128xf32> -> vector<16x128xf32>
    %4 = vector.broadcast %2 : vector<1x128xf32> to vector<16x128xf32>
    %5 = arith.addf %3, %4 : vector<16x128xf32>
    %cst_5 = arith.constant 0.000000e+00 : f32
    %6 = vector.broadcast %cst_5 : f32 to vector<16x128xf32>
    %7 = arith.maximumf %5, %6 : vector<16x128xf32>
    %8 = arith.truncf %7 : vector<16x128xf32> to vector<16x128xbf16>
    %c0_6 = arith.constant 0 : index
    %c0_7 = arith.constant 0 : index
    %9 = vector.load %arg4[%c0_6, %c0_7] : memref<128x128xbf16, #tpu.memory_space<vmem>>, vector<128x128xbf16>
    %c0_8 = arith.constant 0 : index
    %c0_9 = arith.constant 0 : index
    %10 = vector.load %arg5[%c0_8, %c0_9] : memref<1x128xf32, #tpu.memory_space<vmem>>, vector<1x128xf32>
    %cst_10 = arith.constant dense<0.000000e+00> : vector<16x128xf32>
    %11 = tpu.matmul %8, %9, %cst_10 {dimension_numbers = #tpu.dot_dimension_numbers<[1], [0], [0], [1], [0, 0, 1, 1], [], []>} : vector<16x128xbf16>, vector<128x128xbf16>, vector<16x128xf32> -> vector<16x128xf32>
    %12 = vector.broadcast %10 : vector<1x128xf32> to vector<16x128xf32>
    %13 = arith.addf %11, %12 : vector<16x128xf32>
    %cst_11 = arith.constant 0.000000e+00 : f32
    %14 = vector.broadcast %cst_11 : f32 to vector<16x128xf32>
    %15 = arith.maximumf %13, %14 : vector<16x128xf32>
    %16 = arith.truncf %15 : vector<16x128xf32> to vector<16x128xbf16>
    %c0_12 = arith.constant 0 : index
    %c0_13 = arith.constant 0 : index
    %17 = vector.load %arg6[%c0_12, %c0_13] : memref<128x128xbf16, #tpu.memory_space<vmem>>, vector<128x128xbf16>
    %c0_14 = arith.constant 0 : index
    %c0_15 = arith.constant 0 : index
    %18 = vector.load %arg7[%c0_14, %c0_15] : memref<1x128xf32, #tpu.memory_space<vmem>>, vector<1x128xf32>
    %cst_16 = arith.constant dense<0.000000e+00> : vector<16x128xf32>
    %19 = tpu.matmul %16, %17, %cst_16 {dimension_numbers = #tpu.dot_dimension_numbers<[1], [0], [0], [1], [0, 0, 1, 1], [], []>} : vector<16x128xbf16>, vector<128x128xbf16>, vector<16x128xf32> -> vector<16x128xf32>
    %20 = vector.broadcast %18 : vector<1x128xf32> to vector<16x128xf32>
    %21 = arith.addf %19, %20 : vector<16x128xf32>
    %c0_17 = arith.constant 0 : index
    %c0_18 = arith.constant 0 : index
    %22 = vector.load %arg8[%c0_17, %c0_18] : memref<1x128xf32, #tpu.memory_space<vmem>>, vector<1x128xf32>
    %23 = vector.broadcast %22 : vector<1x128xf32> to vector<16x128xf32>
    %24 = arith.mulf %23, %21 : vector<16x128xf32>
    %25 = arith.truncf %24 : vector<16x128xf32> to vector<16x128xbf16>
    %c0_19 = arith.constant 0 : index
    %c0_20 = arith.constant 0 : index
    %26 = vector.load %arg9[%c0_19, %c0_20] : memref<16x128xbf16, #tpu.memory_space<vmem>>, vector<16x128xbf16>
    tpu.vector_store %arg9[%c0_19, %c0_20], %25 {strides = array<i32>} : memref<16x128xbf16, #tpu.memory_space<vmem>>, vector<16x128xbf16>,
    return
  }
  func.func @transform_0(%arg0: i32) -> (i32, i32) {
    %c0_i32 = arith.constant 0 : i32
    %c0_i32_0 = arith.constant 0 : i32
    return %arg0, %c0_i32 : i32, i32
  }
  func.func @transform_1(%arg0: i32) -> (i32, i32) {
    %c0_i32 = arith.constant 0 : i32
    %c0_i32_0 = arith.constant 0 : i32
    %c0_i32_1 = arith.constant 0 : i32
    return %c0_i32, %c0_i32_0 : i32, i32
  }
  func.func @transform_2(%arg0: i32) -> (i32, i32) {
    %c0_i32 = arith.constant 0 : i32
    %c0_i32_0 = arith.constant 0 : i32
    %c0_i32_1 = arith.constant 0 : i32
    return %c0_i32, %c0_i32_0 : i32, i32
  }
  func.func @transform_3(%arg0: i32) -> (i32, i32) {
    %c0_i32 = arith.constant 0 : i32
    %c0_i32_0 = arith.constant 0 : i32
    %c0_i32_1 = arith.constant 0 : i32
    return %c0_i32, %c0_i32_0 : i32, i32
  }
  func.func @transform_4(%arg0: i32) -> (i32, i32) {
    %c0_i32 = arith.constant 0 : i32
    %c0_i32_0 = arith.constant 0 : i32
    %c0_i32_1 = arith.constant 0 : i32
    return %c0_i32, %c0_i32_0 : i32, i32
  }
  func.func @transform_5(%arg0: i32) -> (i32, i32) {
    %c0_i32 = arith.constant 0 : i32
    %c0_i32_0 = arith.constant 0 : i32
    %c0_i32_1 = arith.constant 0 : i32
    return %c0_i32, %c0_i32_0 : i32, i32
  }
  func.func @transform_6(%arg0: i32) -> (i32, i32) {
    %c0_i32 = arith.constant 0 : i32
    %c0_i32_0 = arith.constant 0 : i32
    %c0_i32_1 = arith.constant 0 : i32
    return %c0_i32, %c0_i32_0 : i32, i32
  }
  func.func @transform_7(%arg0: i32) -> (i32, i32) {
    %c0_i32 = arith.constant 0 : i32
    %c0_i32_0 = arith.constant 0 : i32
    %c0_i32_1 = arith.constant 0 : i32
    return %c0_i32, %c0_i32_0 : i32, i32
  }
  func.func @transform_8(%arg0: i32) -> (i32, i32) {
    %c0_i32 = arith.constant 0 : i32
    %c0_i32_0 = arith.constant 0 : i32
    return %arg0, %c0_i32 : i32, i32
  }
}

</mosaic_0001>

<bundles_post_ra>
// kernel: _packnet_forward_impl.1
= control target key start
LH: loop header
LB: loop body
LE: loop exit
PB: predicated region body
PF: predicated region fallthrough
CT: control target
= control target key end

     0   :  { %13 = vsyncpa [#allocation3], 0  ;;  %s784_s0 = inlined_call_operand.vmem [shape: bf16[16,128], index: 0, kind: input, shape index: {}]   ;;  %s785_s1 = inlined_call_operand.vmem [shape: bf16[128,128], index: 1, kind: input, shape index: {}]   ;;  %s786_s2 = inlined_call_operand.vmem [shape: f32[1,128], index: 2, kind: input, shape index: {}]   ;;  %s787_s3 = inlined_call_operand.hbm [shape: bf16[128,128], index: 3, kind: input, shape index: {}]   ;;  %s788_s4 = inlined_call_operand.vmem [shape: f32[1,128], index: 4, kind: input, shape index: {}]   ;;  %s789_s5 = inlined_call_operand.hbm [shape: bf16[128,128], index: 5, kind: input, shape index: {}]   ;;  %s790_s6 = inlined_call_operand.vmem [shape: f32[1,128], index: 6, kind: input, shape index: {}]   ;;  %s791_s7 = inlined_call_operand.vmem [shape: f32[1,128], index: 7, kind: input, shape index: {}]   ;;  %s792_s8 = inlined_call_operand.vmem [shape: bf16[16,128], index: 8, kind: output, shape index: {}]  }
   0x1   :  { %14 = vsyncpa [#allocation5], 0  ;;  %s637_s27 = smov [#allocation2]   ;;  %s589_s9 = scalar_lea.hbm %s787_s3, 1024 }
   0x2   :  { %s26_s28 = sshll.u32 %s637_s27, 4  ;;  %p590_p0 = scmp.ne.s32.totalorder %s787_s3, %s589_s9  ;;  %s27_s28 = int_to_ptr.vmem [resolvable:$true] %s26_s28 }
   0x3   :  { %p593_p1 = scmp.lt.u32.totalorder %s589_s9, %s787_s3 }
   0x5   :  { %p595_p2 = pnand %p593_p1, %p590_p0 }
   0x7   :  { %598 = shalt.err (!%p595_p2)
}
   0x8   :  { %s599_s14 = scalar_lea.vmem %s27_s28, 1024  ;;  %p604_p4 = scmp.lt.s32.totalorder %s27_s28, %s27_s28 }
   0x9   :  { %p600_p3 = scmp.ne.s32.totalorder %s27_s28, %s599_s14  ;;  %p605_p5 = scmp.lt.s32.totalorder %s599_s14, %s599_s14 }
   0xb   :  { %p606_p6 = por %p605_p5, %p604_p4 }
   0xd   :  { %p607_p7 = pnand %p606_p6, %p600_p3 }
   0xf   :  { %610 = shalt.err (!%p607_p7)
}
  0x10   :  { %s638_s15 = smov 64   ;;  %s639_s16 = smov 4  }
  0x11   :  { %32 = dma.hbm_to_vmem [thread:$0]  %s787_s3, 1024, %s27_s28, [#allocation3], %s638_s15, %s638_s15, %s639_s16  }
  0x12   :  { %s640_s19 = smov [#allocation4]   ;;  %s611_s23 = scalar_lea.hbm %s789_s5, 1024 }
  0x13   :  { %s40_s20 = sshll.u32 %s640_s19, 4  ;;  %p612_p8 = scmp.ne.s32.totalorder %s789_s5, %s611_s23  ;;  %s41_s20 = int_to_ptr.vmem [resolvable:$true] %s40_s20 }
  0x14   :  { %p615_p9 = scmp.lt.u32.totalorder %s611_s23, %s789_s5 }
  0x16   :  { %p617_p10 = pnand %p615_p9, %p612_p8 }
  0x18   :  { %620 = shalt.err (!%p617_p10)
}
  0x19   :  { %s621_s29 = scalar_lea.vmem %s41_s20, 1024  ;;  %p626_p12 = scmp.lt.s32.totalorder %s41_s20, %s41_s20 }
  0x1a   :  { %p622_p11 = scmp.ne.s32.totalorder %s41_s20, %s621_s29  ;;  %p627_p13 = scmp.lt.s32.totalorder %s621_s29, %s621_s29 }
  0x1c   :  { %p628_p0 = por %p627_p13, %p626_p12 }
  0x1e   :  { %p629_p1 = pnand %p628_p0, %p622_p11 }
  0x20   :  { %632 = shalt.err (!%p629_p1)
}
  0x21   :  { %46 = dma.hbm_to_vmem [thread:$0]  %s789_s5, 1024, %s41_s20, [#allocation5], %s638_s15, %s638_s15, %s639_s16  }
  0x22   :  { %633 = dma.done.wait [#allocation3], 1024  }
  0x23   :  { %634 = vsyncadd [#allocation3], 4294966272 }
  0x24   :  { %635 = dma.done.wait [#allocation5], 1024  }
  0x25   :  { %636 = vsyncadd [#allocation5], 4294966272  ;;  %v641_v0 = vmov 0.0   ;;  %vm642_vm0 = vmmov 0   ;;  %v564_v1 = vld [vmem:[%s785_s1] sm:$0xff]   ;;  %v565_v2 = vld [vmem:[%s785_s1 + $0x8] sm:$0xff]  }
  0x26   :  { %498 = vmatprep.subr.bf16.mxu0 %v641_v0  ;;  %514 = vmatprep.mubr.msk.bf16.mxu0 %vm642_vm0, %v641_v0  ;;  %v566_v3 = vld [vmem:[%s785_s1 + $0x10] sm:$0xff]   ;;  %v573_v4 = vld [vmem:[#allocation2] sm:$0xff]   ;;  %v567_v5 = vld [vmem:[%s785_s1 + $0x18] sm:$0xff]  }
  0x27   :  { %518 = vmatprep.subr.bf16.mxu1 %v641_v0  ;;  %534 = vmatprep.mubr.msk.bf16.mxu1 %vm642_vm0, %v641_v0  ;;  %v574_v6 = vld [vmem:[#allocation2 + $0x8] sm:$0xff]   ;;  %v568_v7 = vld [vmem:[%s785_s1 + $0x20] sm:$0xff]   ;;  %v575_v8 = vld [vmem:[#allocation2 + $0x10] sm:$0xff]  }
  0x28   :  { %499 = vmatpush3.bf16.msra.mxu0 %v564_v1  ;;  %519 = vmatpush3.bf16.msra.mxu1 %v573_v4  ;;  %v569_v9 = vld [vmem:[%s785_s1 + $0x28] sm:$0xff]   ;;  %v576_v10 = vld [vmem:[#allocation2 + $0x18] sm:$0xff]   ;;  %v570_v11 = vld [vmem:[%s785_s1 + $0x30] sm:$0xff]  }
  0x29   :  { %500 = vmatprep.subr.bf16.mxu0 %v641_v0  ;;  %520 = vmatprep.subr.bf16.mxu1 %v641_v0  ;;  %v577_v12 = vld [vmem:[#allocation2 + $0x20] sm:$0xff]   ;;  %v571_v13 = vld [vmem:[%s785_s1 + $0x38] sm:$0xff]   ;;  %v578_v14 = vld [vmem:[#allocation2 + $0x28] sm:$0xff]  }
  0x2a   :  { %v572_v15 = vld [vmem:[%s784_s0] sm:$0xff]   ;;  %v579_v16 = vld [vmem:[#allocation2 + $0x30] sm:$0xff]   ;;  %v580_v17 = vld [vmem:[#allocation2 + $0x38] sm:$0xff]  }
  0x2b   :  { %v581_v18 = vld [vmem:[#allocation4] sm:$0xff]   ;;  %v582_v19 = vld [vmem:[#allocation4 + $0x8] sm:$0xff]   ;;  %v583_v20 = vld [vmem:[#allocation4 + $0x10] sm:$0xff]  }
  0x2c   :  { %501 = vmatpush3.bf16.msra.mxu0 %v565_v2  ;;  %521 = vmatpush3.bf16.msra.mxu1 %v574_v6  ;;  %v584_v21 = vld [vmem:[#allocation4 + $0x18] sm:$0xff]   ;;  %v585_v22 = vld [vmem:[#allocation4 + $0x20] sm:$0xff]   ;;  %v586_v23 = vld [vmem:[#allocation4 + $0x28] sm:$0xff]  }
  0x2d   :  { %502 = vmatprep.subr.bf16.mxu0 %v641_v0  ;;  %522 = vmatprep.subr.bf16.mxu1 %v641_v0  ;;  %v433_v24 = vld [vmem:[%s786_s2] ss:$0 sm:$0xff]  ;;  %v587_v34 = vld [vmem:[#allocation4 + $0x30] sm:$0xff]   ;;  %v588_v35 = vld [vmem:[#allocation4 + $0x38] sm:$0xff]  }
  0x2e   :  { %v443_v36 = vld [vmem:[%s788_s4] ss:$0 sm:$0xff] }
  0x2f   :  { %v452_v46 = vld [vmem:[%s790_s6] ss:$0 sm:$0xff] }
  0x30   :  { %503 = vmatpush3.bf16.msra.mxu0 %v566_v3  ;;  %523 = vmatpush3.bf16.msra.mxu1 %v575_v8  ;;  %v461_v50 = vld [vmem:[%s791_s7] ss:$0 sm:$0xff] }
  0x31   :  { %504 = vmatprep.subr.bf16.mxu0 %v641_v0  ;;  %524 = vmatprep.subr.bf16.mxu1 %v641_v0 }
  0x34   :  { %505 = vmatpush3.bf16.msra.mxu0 %v567_v5  ;;  %525 = vmatpush3.bf16.msra.mxu1 %v576_v10 }
  0x35   :  { %506 = vmatprep.subr.bf16.mxu0 %v641_v0  ;;  %526 = vmatprep.subr.bf16.mxu1 %v641_v0 }
  0x38   :  { %507 = vmatpush3.bf16.msra.mxu0 %v568_v7  ;;  %527 = vmatpush3.bf16.msra.mxu1 %v577_v12 }
  0x39   :  { %508 = vmatprep.subr.bf16.mxu0 %v641_v0  ;;  %528 = vmatprep.subr.bf16.mxu1 %v641_v0 }
  0x3c   :  { %509 = vmatpush3.bf16.msra.mxu0 %v569_v9  ;;  %529 = vmatpush3.bf16.msra.mxu1 %v578_v14 }
  0x3d   :  { %510 = vmatprep.subr.bf16.mxu0 %v641_v0  ;;  %530 = vmatprep.subr.bf16.mxu1 %v641_v0 }
  0x40   :  { %511 = vmatpush3.bf16.msra.mxu0 %v570_v11  ;;  %531 = vmatpush3.bf16.msra.mxu1 %v579_v16 }
  0x41   :  { %512 = vmatprep.subr.bf16.mxu0 %v641_v0  ;;  %532 = vmatprep.subr.bf16.mxu1 %v641_v0 }
  0x44   :  { %513 = vmatpush3.bf16.msra.mxu0 %v571_v13  ;;  %533 = vmatpush3.bf16.msra.mxu1 %v580_v17 }
  0x45   :  { %538 = vmatprep.subr.bf16.mxu0 %v641_v0 }
  0x47   :  { %515 = vmatmul.mubr.bf16.vlgmr.msra.gmra.mrb[0].mxu0 %v572_v15 }
  0x48   :  { %554 = vmatprep.mubr.msk.bf16.mxu0 %vm642_vm0, %v641_v0  ;;  %539 = vmatpush3.bf16.msra.mxu0 %v581_v18 }
  0x49   :  { %540 = vmatprep.subr.bf16.mxu0 %v641_v0 }
  0x4c   :  { %541 = vmatpush3.bf16.msra.mxu0 %v582_v19 }
  0x4d   :  { %542 = vmatprep.subr.bf16.mxu0 %v641_v0 }
  0x50   :  { %543 = vmatpush3.bf16.msra.mxu0 %v583_v20 }
  0x51   :  { %544 = vmatprep.subr.bf16.mxu0 %v641_v0 }
  0x54   :  { %545 = vmatpush3.bf16.msra.mxu0 %v584_v21 }
  0x55   :  { %546 = vmatprep.subr.bf16.mxu0 %v641_v0 }
  0x58   :  { %547 = vmatpush3.bf16.msra.mxu0 %v585_v22 }
  0x59   :  { %548 = vmatprep.subr.bf16.mxu0 %v641_v0 }
  0x5c   :  { %549 = vmatpush3.bf16.msra.mxu0 %v586_v23 }
  0x5d   :  { %550 = vmatprep.subr.bf16.mxu0 %v641_v0 }
  0x60   :  { %551 = vmatpush3.bf16.msra.mxu0 %v587_v34 }
  0x61   :  { %552 = vmatprep.subr.bf16.mxu0 %v641_v0 }
  0x64   :  { %553 = vmatpush3.bf16.msra.mxu0 %v588_v35 }
 0x11a   :  { %v171_v25 = vpop.f32.mrb[0].mxu0 }
 0x11b   :  { %v172_v26 = vadd.f32 %v433_v24, %v171_v25  ;;  %v516_v27 = vpop.f32.mrb[1].mxu0 }
 0x11c   :  { %v174_v28 = vpop.f32.mrb[2].mxu0 }
 0x11d   :  { %v175_v29 = vadd.f32 %v433_v24, %v174_v28  ;;  %v517_v30 = vpop.f32.mrb[3].mxu0  ;;  %v178_v31 = vmax.f32 %v172_v26, 0.0 }
 0x11f   :  { %v179_v32 = vmax.f32 %v175_v29, 0.0 }
 0x121   :  { %v180_v33 = vpack.c.bf16 %v179_v32, %v178_v31 }
 0x123   :  { %535 = vmatmul.mubr.bf16.vlgmr.msra.gmra.mrb[0].mxu1 %v180_v33 }
 0x1f6   :  { %v286_v37 = vpop.f32.mrb[0].mxu1 }
 0x1f7   :  { %v287_v38 = vadd.f32 %v443_v36, %v286_v37  ;;  %v536_v39 = vpop.f32.mrb[1].mxu1 }
 0x1f8   :  { %v289_v40 = vpop.f32.mrb[2].mxu1 }
 0x1f9   :  { %v290_v41 = vadd.f32 %v443_v36, %v289_v40  ;;  %v537_v42 = vpop.f32.mrb[3].mxu1  ;;  %v293_v43 = vmax.f32 %v287_v38, 0.0 }
 0x1fb   :  { %v294_v44 = vmax.f32 %v290_v41, 0.0 }
 0x1fd   :  { %v295_v45 = vpack.c.bf16 %v294_v44, %v293_v43 }
 0x1ff   :  { %555 = vmatmul.mubr.bf16.vlgmr.msra.gmra.mrb[4].mxu0 %v295_v45 }
 0x2d2   :  { %v401_v47 = vpop.f32.mrb[4].mxu0 }
 0x2d3   :  { %v402_v48 = vadd.f32 %v452_v46, %v401_v47  ;;  %v556_v49 = vpop.f32.mrb[5].mxu0 }
 0x2d4   :  { %v404_v51 = vpop.f32.mrb[6].mxu0 }
 0x2d5   :  { %v405_v52 = vadd.f32 %v452_v46, %v404_v51  ;;  %v557_v53 = vpop.f32.mrb[7].mxu0  ;;  %v415_v54 = vmul.f32 %v461_v50, %v402_v48 }
 0x2d7   :  { %v416_v55 = vmul.f32 %v461_v50, %v405_v52 }
 0x2d9   :  { %v469_v56 = vpack.c.bf16 %v416_v55, %v415_v54 }
 0x2db   :  { %470 = vst [vmem:[%s792_s8] sm:$0xff] %v469_v56  }
 0x2dc   :  { %431 = vsyncpa [#allocation3], 1 }
 0x2dd   :  { %432 = vsyncpa [#allocation5], 1 }

</bundles_post_ra>
